<compile_context>
chip_gen: v7x
topology: tpu7x:2x2x1
jax: 0.10.0
libtpu: 0.0.40
codegen_flags: <defaults>
</compile_context>

<pallas_src>
import jax
import jax.numpy as jnp
from jax.experimental import pallas as pl
from jax.experimental.pallas import tpu as pltpu


def _nconv_kernel(x_ref, at_ref, o_ref):
    """One (batch-tile, L-tile) grid step.

    x_ref : (TB, Vp, TL)   activation slab
    at_ref: (W,  Vp)       A^T, VMEM-resident for the whole grid
    o_ref : (TB, W,  TL)   output slab (written exactly once)
    """
    a_t = at_ref[...]                       # loaded once, reused for TB matmuls
    for b in range(x_ref.shape[0]):         # static unroll: back-to-back MXU calls
        o_ref[b] = jnp.dot(
            a_t, x_ref[b],
            preferred_element_type=jnp.float32,
        ).astype(o_ref.dtype)


def _pick_tile(dim, max_tile, align):
    """Largest multiple of `align` <= max_tile dividing `dim` (falls back to dim)."""
    if dim <= max_tile:
        return dim
    t = (max_tile // align) * align
    while t >= align:
        if dim % t == 0:
            return t
        t -= align
    return dim


def _round_up(x, m):
    return -(-x // m) * m


def nconv(x, A, *, max_tile_l=256, max_batch_tile=16,
          compute_dtype=None, out_dtype=None):
    """Pallas-backed torch.einsum('ncvl,vw->ncwl', x, A)."""
    N, C, V, L = x.shape
    Va, W = A.shape
    assert Va == V, f"A.shape[0]={Va} must equal node dim V={V}"
    if out_dtype is None:
        out_dtype = x.dtype
    if compute_dtype is not None:        # e.g. jnp.bfloat16: halves HBM traffic,
        x = x.astype(compute_dtype)      # MXU still accumulates in f32.
        A = A.astype(compute_dtype)

    B = N * C
    xb = x.reshape(B, V, L)
    a_t = A.T                            # (W, V): canonical MXU feed, one-time tiny transpose

    # Pad the contraction dim to a sublane multiple (zero rows contribute 0).
    Vp = _round_up(V, 8)
    if Vp != V:
        xb = jnp.pad(xb, ((0, 0), (0, Vp - V), (0, 0)))
        a_t = jnp.pad(a_t, ((0, 0), (0, Vp - V)))

    # L (lane) tiling: full extent when small, otherwise 128-aligned tiles.
    if L <= max_tile_l:
        Lp, TL = L, L
    else:
        Lp = _round_up(L, 128)
        if Lp != L:
            xb = jnp.pad(xb, ((0, 0), (0, 0), (0, Lp - L)))
        TL = _pick_tile(Lp, max_tile_l, 128)

    # Batch tile: amortize per-grid-step overhead, bounded by a VMEM budget.
    in_bytes = jnp.dtype(xb.dtype).itemsize
    out_bytes = jnp.dtype(out_dtype).itemsize
    per_b_bytes = Vp * TL * in_bytes + W * TL * out_bytes
    tb_cap = max(1, min(max_batch_tile, (8 << 20) // max(per_b_bytes, 1)))
    TB = _pick_tile(B, tb_cap, 1)

    grid = (B // TB, Lp // TL)

    # Explicit scoped-VMEM budget: resident A + double-buffered x/out tiles + headroom.
    a_bytes = W * Vp * jnp.dtype(a_t.dtype).itemsize
    needed = 2 * a_bytes + 2 * TB * per_b_bytes + (2 << 20)
    vmem_limit = int(min(max(needed, 32 << 20), 60 << 20))
    # TODO(synk): if A itself outgrows VMEM (W*Vp of many MiB), re-introduce a
    # V-tiled reduction grid axis with an f32 accumulator instead of resident A.

    out = pl.pallas_call(
        _nconv_kernel,
        out_shape=jax.ShapeDtypeStruct((B, W, Lp), out_dtype),
        grid=grid,
        in_specs=[
            pl.BlockSpec((TB, Vp, TL), lambda b, l: (b, 0, l)),   # x slab
            pl.BlockSpec((W, Vp), lambda b, l: (0, 0)),           # A^T, resident
        ],
        out_specs=pl.BlockSpec((TB, W, TL), lambda b, l: (b, 0, l)),
        compiler_params=pltpu.CompilerParams(
            dimension_semantics=("parallel", "parallel"),
            vmem_limit_bytes=vmem_limit),
    )(xb, a_t)

    if Lp != L:
        out = out[:, :, :L]
    # TODO(synk): torch's .contiguous() is a layout no-op in JAX; nothing to emit.
    return out.reshape(N, C, W, L)


if __name__ == "__main__":
    key = jax.random.PRNGKey(0)
    kx, ka = jax.random.split(key)

    # Small shapes consistent with the module: (batch, channels, nodes, seq)
    n, c, v, l = 2, 4, 16, 16
    x = jax.random.normal(kx, (n, c, v, l), jnp.float32)
    A = jax.random.normal(ka, (v, v), jnp.float32)

    out = jax.block_until_ready(nconv(x, A))
    assert out.shape == (n, c, v, l)

    ref = jnp.einsum("ncvl,vw->ncwl", x, A, precision=jax.lax.Precision.HIGHEST)
    assert jnp.allclose(out, ref, rtol=1e-4, atol=1e-4), float(
        jnp.max(jnp.abs(out - ref)))
    print("KERNEL_OK")
</pallas_src>

<mosaic_0001>
module attributes {stable_mosaic.version = 11 : i64} {
  func.func @_nconv_kernel(%arg0: i32, %arg1: i32, %arg2: memref<8x16x16xf32, #tpu.memory_space<vmem>>, %arg3: memref<16x16xf32, #tpu.memory_space<vmem>>, %arg4: memref<8x16x16xf32, #tpu.memory_space<vmem>>) attributes {dimension_semantics = [#tpu.dimension_semantics<parallel>, #tpu.dimension_semantics<parallel>], iteration_bounds = array<i64: 1, 1>, scalar_prefetch = 0 : i64, scratch_operands = 0 : i64, tpu.core_type = #tpu.core_type<tc>, window_params = [{transform_indices = @transform_0, window_bounds = array<i64: 8, 16, 16>}, {pipeline_mode = #tpu.pipeline_mode<synchronous>, transform_indices = @transform_1, window_bounds = array<i64: 16, 16>}, {transform_indices = @transform_2, window_bounds = array<i64: 8, 16, 16>}]} {
    %c0 = arith.constant 0 : index
    %c0_0 = arith.constant 0 : index
    %0 = vector.load %arg3[%c0, %c0_0] : memref<16x16xf32, #tpu.memory_space<vmem>>, vector<16x16xf32>
    %c0_1 = arith.constant 0 : index
    %c0_2 = arith.constant 0 : index
    %c0_3 = arith.constant 0 : index
    %1 = vector.load %arg2[%c0_1, %c0_2, %c0_3] : memref<8x16x16xf32, #tpu.memory_space<vmem>>, vector<1x16x16xf32>
    %2 = vector.shape_cast %1 : vector<1x16x16xf32> to vector<16x16xf32>
    %cst = arith.constant dense<0.000000e+00> : vector<16x16xf32>
    %3 = tpu.matmul %0, %2, %cst {dimension_numbers = #tpu.dot_dimension_numbers<[1], [0], [0], [1], [0, 0, 1, 1], [], []>} : vector<16x16xf32>, vector<16x16xf32>, vector<16x16xf32> -> vector<16x16xf32>
    %c0_4 = arith.constant 0 : index
    %c0_5 = arith.constant 0 : index
    %c0_6 = arith.constant 0 : index
    %4 = vector.load %arg4[%c0_4, %c0_5, %c0_6] : memref<8x16x16xf32, #tpu.memory_space<vmem>>, vector<1x16x16xf32>
    %5 = vector.shape_cast %4 : vector<1x16x16xf32> to vector<16x16xf32>
    %6 = vector.shape_cast %3 : vector<16x16xf32> to vector<1x16x16xf32>
    tpu.vector_store %arg4[%c0_4, %c0_5, %c0_6], %6 {strides = array<i32>} : memref<8x16x16xf32, #tpu.memory_space<vmem>>, vector<1x16x16xf32>,
    %c1 = arith.constant 1 : index
    %c0_7 = arith.constant 0 : index
    %c0_8 = arith.constant 0 : index
    %7 = vector.load %arg2[%c1, %c0_7, %c0_8] : memref<8x16x16xf32, #tpu.memory_space<vmem>>, vector<1x16x16xf32>
    %8 = vector.shape_cast %7 : vector<1x16x16xf32> to vector<16x16xf32>
    %cst_9 = arith.constant dense<0.000000e+00> : vector<16x16xf32>
    %9 = tpu.matmul %0, %8, %cst_9 {dimension_numbers = #tpu.dot_dimension_numbers<[1], [0], [0], [1], [0, 0, 1, 1], [], []>} : vector<16x16xf32>, vector<16x16xf32>, vector<16x16xf32> -> vector<16x16xf32>
    %c1_10 = arith.constant 1 : index
    %c0_11 = arith.constant 0 : index
    %c0_12 = arith.constant 0 : index
    %10 = vector.load %arg4[%c1_10, %c0_11, %c0_12] : memref<8x16x16xf32, #tpu.memory_space<vmem>>, vector<1x16x16xf32>
    %11 = vector.shape_cast %10 : vector<1x16x16xf32> to vector<16x16xf32>
    %12 = vector.shape_cast %9 : vector<16x16xf32> to vector<1x16x16xf32>
    tpu.vector_store %arg4[%c1_10, %c0_11, %c0_12], %12 {strides = array<i32>} : memref<8x16x16xf32, #tpu.memory_space<vmem>>, vector<1x16x16xf32>,
    %c2 = arith.constant 2 : index
    %c0_13 = arith.constant 0 : index
    %c0_14 = arith.constant 0 : index
    %13 = vector.load %arg2[%c2, %c0_13, %c0_14] : memref<8x16x16xf32, #tpu.memory_space<vmem>>, vector<1x16x16xf32>
    %14 = vector.shape_cast %13 : vector<1x16x16xf32> to vector<16x16xf32>
    %cst_15 = arith.constant dense<0.000000e+00> : vector<16x16xf32>
    %15 = tpu.matmul %0, %14, %cst_15 {dimension_numbers = #tpu.dot_dimension_numbers<[1], [0], [0], [1], [0, 0, 1, 1], [], []>} : vector<16x16xf32>, vector<16x16xf32>, vector<16x16xf32> -> vector<16x16xf32>
    %c2_16 = arith.constant 2 : index
    %c0_17 = arith.constant 0 : index
    %c0_18 = arith.constant 0 : index
    %16 = vector.load %arg4[%c2_16, %c0_17, %c0_18] : memref<8x16x16xf32, #tpu.memory_space<vmem>>, vector<1x16x16xf32>
    %17 = vector.shape_cast %16 : vector<1x16x16xf32> to vector<16x16xf32>
    %18 = vector.shape_cast %15 : vector<16x16xf32> to vector<1x16x16xf32>
    tpu.vector_store %arg4[%c2_16, %c0_17, %c0_18], %18 {strides = array<i32>} : memref<8x16x16xf32, #tpu.memory_space<vmem>>, vector<1x16x16xf32>,
    %c3 = arith.constant 3 : index
    %c0_19 = arith.constant 0 : index
    %c0_20 = arith.constant 0 : index
    %19 = vector.load %arg2[%c3, %c0_19, %c0_20] : memref<8x16x16xf32, #tpu.memory_space<vmem>>, vector<1x16x16xf32>
    %20 = vector.shape_cast %19 : vector<1x16x16xf32> to vector<16x16xf32>
    %cst_21 = arith.constant dense<0.000000e+00> : vector<16x16xf32>
    %21 = tpu.matmul %0, %20, %cst_21 {dimension_numbers = #tpu.dot_dimension_numbers<[1], [0], [0], [1], [0, 0, 1, 1], [], []>} : vector<16x16xf32>, vector<16x16xf32>, vector<16x16xf32> -> vector<16x16xf32>
    %c3_22 = arith.constant 3 : index
    %c0_23 = arith.constant 0 : index
    %c0_24 = arith.constant 0 : index
    %22 = vector.load %arg4[%c3_22, %c0_23, %c0_24] : memref<8x16x16xf32, #tpu.memory_space<vmem>>, vector<1x16x16xf32>
    %23 = vector.shape_cast %22 : vector<1x16x16xf32> to vector<16x16xf32>
    %24 = vector.shape_cast %21 : vector<16x16xf32> to vector<1x16x16xf32>
    tpu.vector_store %arg4[%c3_22, %c0_23, %c0_24], %24 {strides = array<i32>} : memref<8x16x16xf32, #tpu.memory_space<vmem>>, vector<1x16x16xf32>,
    %c4 = arith.constant 4 : index
    %c0_25 = arith.constant 0 : index
    %c0_26 = arith.constant 0 : index
    %25 = vector.load %arg2[%c4, %c0_25, %c0_26] : memref<8x16x16xf32, #tpu.memory_space<vmem>>, vector<1x16x16xf32>
    %26 = vector.shape_cast %25 : vector<1x16x16xf32> to vector<16x16xf32>
    %cst_27 = arith.constant dense<0.000000e+00> : vector<16x16xf32>
    %27 = tpu.matmul %0, %26, %cst_27 {dimension_numbers = #tpu.dot_dimension_numbers<[1], [0], [0], [1], [0, 0, 1, 1], [], []>} : vector<16x16xf32>, vector<16x16xf32>, vector<16x16xf32> -> vector<16x16xf32>
    %c4_28 = arith.constant 4 : index
    %c0_29 = arith.constant 0 : index
    %c0_30 = arith.constant 0 : index
    %28 = vector.load %arg4[%c4_28, %c0_29, %c0_30] : memref<8x16x16xf32, #tpu.memory_space<vmem>>, vector<1x16x16xf32>
    %29 = vector.shape_cast %28 : vector<1x16x16xf32> to vector<16x16xf32>
    %30 = vector.shape_cast %27 : vector<16x16xf32> to vector<1x16x16xf32>
    tpu.vector_store %arg4[%c4_28, %c0_29, %c0_30], %30 {strides = array<i32>} : memref<8x16x16xf32, #tpu.memory_space<vmem>>, vector<1x16x16xf32>,
    %c5 = arith.constant 5 : index
    %c0_31 = arith.constant 0 : index
    %c0_32 = arith.constant 0 : index
    %31 = vector.load %arg2[%c5, %c0_31, %c0_32] : memref<8x16x16xf32, #tpu.memory_space<vmem>>, vector<1x16x16xf32>
    %32 = vector.shape_cast %31 : vector<1x16x16xf32> to vector<16x16xf32>
    %cst_33 = arith.constant dense<0.000000e+00> : vector<16x16xf32>
    %33 = tpu.matmul %0, %32, %cst_33 {dimension_numbers = #tpu.dot_dimension_numbers<[1], [0], [0], [1], [0, 0, 1, 1], [], []>} : vector<16x16xf32>, vector<16x16xf32>, vector<16x16xf32> -> vector<16x16xf32>
    %c5_34 = arith.constant 5 : index
    %c0_35 = arith.constant 0 : index
    %c0_36 = arith.constant 0 : index
    %34 = vector.load %arg4[%c5_34, %c0_35, %c0_36] : memref<8x16x16xf32, #tpu.memory_space<vmem>>, vector<1x16x16xf32>
    %35 = vector.shape_cast %34 : vector<1x16x16xf32> to vector<16x16xf32>
    %36 = vector.shape_cast %33 : vector<16x16xf32> to vector<1x16x16xf32>
    tpu.vector_store %arg4[%c5_34, %c0_35, %c0_36], %36 {strides = array<i32>} : memref<8x16x16xf32, #tpu.memory_space<vmem>>, vector<1x16x16xf32>,
    %c6 = arith.constant 6 : index
    %c0_37 = arith.constant 0 : index
    %c0_38 = arith.constant 0 : index
    %37 = vector.load %arg2[%c6, %c0_37, %c0_38] : memref<8x16x16xf32, #tpu.memory_space<vmem>>, vector<1x16x16xf32>
    %38 = vector.shape_cast %37 : vector<1x16x16xf32> to vector<16x16xf32>
    %cst_39 = arith.constant dense<0.000000e+00> : vector<16x16xf32>
    %39 = tpu.matmul %0, %38, %cst_39 {dimension_numbers = #tpu.dot_dimension_numbers<[1], [0], [0], [1], [0, 0, 1, 1], [], []>} : vector<16x16xf32>, vector<16x16xf32>, vector<16x16xf32> -> vector<16x16xf32>
    %c6_40 = arith.constant 6 : index
    %c0_41 = arith.constant 0 : index
    %c0_42 = arith.constant 0 : index
    %40 = vector.load %arg4[%c6_40, %c0_41, %c0_42] : memref<8x16x16xf32, #tpu.memory_space<vmem>>, vector<1x16x16xf32>
    %41 = vector.shape_cast %40 : vector<1x16x16xf32> to vector<16x16xf32>
    %42 = vector.shape_cast %39 : vector<16x16xf32> to vector<1x16x16xf32>
    tpu.vector_store %arg4[%c6_40, %c0_41, %c0_42], %42 {strides = array<i32>} : memref<8x16x16xf32, #tpu.memory_space<vmem>>, vector<1x16x16xf32>,
    %c7 = arith.constant 7 : index
    %c0_43 = arith.constant 0 : index
    %c0_44 = arith.constant 0 : index
    %43 = vector.load %arg2[%c7, %c0_43, %c0_44] : memref<8x16x16xf32, #tpu.memory_space<vmem>>, vector<1x16x16xf32>
    %44 = vector.shape_cast %43 : vector<1x16x16xf32> to vector<16x16xf32>
    %cst_45 = arith.constant dense<0.000000e+00> : vector<16x16xf32>
    %45 = tpu.matmul %0, %44, %cst_45 {dimension_numbers = #tpu.dot_dimension_numbers<[1], [0], [0], [1], [0, 0, 1, 1], [], []>} : vector<16x16xf32>, vector<16x16xf32>, vector<16x16xf32> -> vector<16x16xf32>
    %c7_46 = arith.constant 7 : index
    %c0_47 = arith.constant 0 : index
    %c0_48 = arith.constant 0 : index
    %46 = vector.load %arg4[%c7_46, %c0_47, %c0_48] : memref<8x16x16xf32, #tpu.memory_space<vmem>>, vector<1x16x16xf32>
    %47 = vector.shape_cast %46 : vector<1x16x16xf32> to vector<16x16xf32>
    %48 = vector.shape_cast %45 : vector<16x16xf32> to vector<1x16x16xf32>
    tpu.vector_store %arg4[%c7_46, %c0_47, %c0_48], %48 {strides = array<i32>} : memref<8x16x16xf32, #tpu.memory_space<vmem>>, vector<1x16x16xf32>,
    return
  }
  func.func @transform_0(%arg0: i32, %arg1: i32) -> (i32, i32, i32) {
    %c0_i32 = arith.constant 0 : i32
    %c0_i32_0 = arith.constant 0 : i32
    return %arg0, %c0_i32, %arg1 : i32, i32, i32
  }
  func.func @transform_1(%arg0: i32, %arg1: i32) -> (i32, i32) {
    %c0_i32 = arith.constant 0 : i32
    %c0_i32_0 = arith.constant 0 : i32
    %c0_i32_1 = arith.constant 0 : i32
    return %c0_i32, %c0_i32_0 : i32, i32
  }
  func.func @transform_2(%arg0: i32, %arg1: i32) -> (i32, i32, i32) {
    %c0_i32 = arith.constant 0 : i32
    %c0_i32_0 = arith.constant 0 : i32
    return %arg0, %c0_i32, %arg1 : i32, i32, i32
  }
}

</mosaic_0001>

<bundles_post_ra>
// kernel: tpu_custom_call.1
= control target key start
LH: loop header
LB: loop body
LE: loop exit
PB: predicated region body
PF: predicated region fallthrough
CT: control target
= control target key end

     0   :  { %7 = vsyncpa [#allocation3], 0  ;;  %s1023_s0 = inlined_call_operand.hbm [shape: f32[8,16,16], index: 0, kind: input, shape index: {}]   ;;  %s1024_s1 = inlined_call_operand.hbm [shape: f32[16,16], index: 1, kind: input, shape index: {}]   ;;  %s1025_s2 = inlined_call_operand.hbm [shape: f32[8,16,16], index: 2, kind: output, shape index: {}]  }
   0x1   :  { %8 = vsyncpa [#allocation6], 0 }
   0x2   :  { %9 = vsyncpa [#allocation4], 0  ;;  %s926_s9 = smov [#allocation2]   ;;  %s854_s13 = scalar_lea.hbm %s1023_s0, 2048 }
   0x3   :  { %s15_s10 = sshll.u32 %s926_s9, 4  ;;  %p855_p0 = scmp.ne.s32.totalorder %s1023_s0, %s854_s13  ;;  %s16_s10 = int_to_ptr.vmem [resolvable:$true] %s15_s10 }
   0x4   :  { %p858_p1 = scmp.lt.u32.totalorder %s854_s13, %s1023_s0 }
   0x6   :  { %p860_p2 = pnand %p858_p1, %p855_p0 }
   0x8   :  { %863 = shalt.err (!%p860_p2)
}
   0x9   :  { %s864_s18 = scalar_lea.vmem %s16_s10, 2048  ;;  %p869_p4 = scmp.lt.s32.totalorder %s16_s10, %s16_s10 }
   0xa   :  { %p865_p3 = scmp.ne.s32.totalorder %s16_s10, %s864_s18  ;;  %p870_p5 = scmp.lt.s32.totalorder %s864_s18, %s864_s18 }
   0xc   :  { %p871_p6 = por %p870_p5, %p869_p4 }
   0xe   :  { %p872_p7 = pnand %p871_p6, %p865_p3 }
  0x10   :  { %875 = shalt.err (!%p872_p7)
}
  0x11   :  { %s927_s19 = smov 128   ;;  %s928_s20 = smov 8  }
  0x12   :  { %21 = dma.hbm_to_vmem [thread:$0]  %s1023_s0, 2048, %s16_s10, [#allocation3], %s927_s19, %s927_s19, %s928_s20  }
  0x13   :  { %s929_s23 = smov [#allocation5]   ;;  %s876_s27 = scalar_lea.hbm %s1024_s1, 256 }
  0x14   :  { %s27_s24 = sshll.u32 %s929_s23, 4  ;;  %p877_p8 = scmp.ne.s32.totalorder %s1024_s1, %s876_s27  ;;  %s28_s24 = int_to_ptr.vmem [resolvable:$true] %s27_s24 }
  0x15   :  { %p880_p9 = scmp.lt.u32.totalorder %s876_s27, %s1024_s1 }
  0x17   :  { %p882_p10 = pnand %p880_p9, %p877_p8 }
  0x19   :  { %885 = shalt.err (!%p882_p10)
}
  0x1a   :  { %s886_s4 = scalar_lea.vmem %s28_s24, 256  ;;  %p891_p12 = scmp.lt.s32.totalorder %s28_s24, %s28_s24 }
  0x1b   :  { %p887_p11 = scmp.ne.s32.totalorder %s28_s24, %s886_s4  ;;  %p892_p13 = scmp.lt.s32.totalorder %s886_s4, %s886_s4 }
  0x1d   :  { %p893_p0 = por %p892_p13, %p891_p12 }
  0x1f   :  { %p894_p1 = pnand %p893_p0, %p887_p11 }
  0x21   :  { %897 = shalt.err (!%p894_p1)
}
  0x22   :  { %33 = dma.hbm_to_vmem [thread:$0]  %s1024_s1, 256, %s28_s24, [#allocation6], %s927_s19, %s927_s19, %s928_s20  }
  0x23   :  { %920 = dma.done.wait [#allocation3], 2048  }
  0x24   :  { %921 = vsyncadd [#allocation3], 4294965248 }
  0x25   :  { %922 = dma.done.wait [#allocation6], 256  }
  0x26   :  { %923 = vsyncadd [#allocation6], 4294967040  ;;  %vm44_vm0 = vcmask 130048   ;;  %v42_v0 = vld [vmem:[#allocation2] sm:$0xff]  ;;  %v43_v1 = vld [vmem:[#allocation2 + $0x8] sm:$0xff]  ;;  %s930_s1 = smov [#allocation7]  }
  0x27   :  { %v129_v2 = vld [vmem:[#allocation2 + $0x10] sm:$0xff]  ;;  %v817_v3 = vpack.c.bf16 %v43_v1, %v42_v0  ;;  %v130_v4 = vld [vmem:[#allocation2 + $0x18] sm:$0xff]  ;;  %v40_v5 = vld [vmem:[#allocation5] sm:$0xff]  ;;  %s700_s6 = sshll.u32 %s930_s1, 4  ;;  %s701_s6 = int_to_ptr.vmem [resolvable:$true] %s700_s6 }
  0x28   :  { %v821_v6 = vpack.c.bf16 %v130_v4, %v129_v2  ;;  %765 = vmatprep.mubr.msk.f32.mxu0 %vm44_vm0, %v40_v5  ;;  %772 = vmatprep.mubr.msk.f32.mxu1 %vm44_vm0, %v40_v5  ;;  %v210_v7 = vld [vmem:[#allocation2 + $0x20] sm:$0xff]  ;;  %v211_v8 = vld [vmem:[#allocation2 + $0x28] sm:$0xff]  ;;  %v291_v9 = vld [vmem:[#allocation2 + $0x30] sm:$0xff]  ;;  %s898_s7 = scalar_lea.vmem %s701_s6, 2048  ;;  %p903_p3 = scmp.lt.s32.totalorder %s701_s6, %s701_s6 }
  0x29   :  { %818 = vmatprep.subr.bf16.mxu0 %v817_v3  ;;  %v825_v10 = vpack.c.bf16 %v211_v8, %v210_v7  ;;  %v292_v11 = vld [vmem:[#allocation2 + $0x38] sm:$0xff]  ;;  %v372_v12 = vld [vmem:[#allocation2 + $0x40] sm:$0xff]  ;;  %v373_v13 = vld [vmem:[#allocation2 + $0x48] sm:$0xff]  ;;  %p899_p2 = scmp.ne.s32.totalorder %s701_s6, %s898_s7  ;;  %p904_p4 = scmp.lt.s32.totalorder %s898_s7, %s898_s7 }
  0x2a   :  { %822 = vmatprep.subr.bf16.mxu1 %v821_v6  ;;  %820 = vmatpush3.bf16.msra.mxu0 %v817_v3  ;;  %v41_v14 = vld [vmem:[#allocation5 + $0x8] sm:$0xff]  ;;  %v829_v15 = vpack.c.bf16 %v292_v11, %v291_v9  ;;  %v453_v16 = vld [vmem:[#allocation2 + $0x50] sm:$0xff]  ;;  %v454_v17 = vld [vmem:[#allocation2 + $0x58] sm:$0xff]  ;;  %v833_v18 = vpack.c.bf16 %v373_v13, %v372_v12 }
  0x2b   :  { %824 = vmatpush3.bf16.msra.mxu1 %v821_v6  ;;  %826 = vmatprep.subr.bf16.mxu0 %v825_v10  ;;  %v837_v19 = vpack.c.bf16 %v454_v17, %v453_v16  ;;  %v534_v20 = vld [vmem:[#allocation2 + $0x60] sm:$0xff]  ;;  %v535_v21 = vld [vmem:[#allocation2 + $0x68] sm:$0xff]  ;;  %v615_v22 = vld [vmem:[#allocation2 + $0x70] sm:$0xff]  ;;  %p905_p5 = por %p904_p4, %p903_p3 }
  0x2c   :  { %830 = vmatprep.subr.bf16.mxu1 %v829_v15  ;;  %v616_v23 = vld [vmem:[#allocation2 + $0x78] sm:$0xff]  ;;  %v841_v24 = vpack.c.bf16 %v535_v21, %v534_v20 }
  0x2d   :  { %766 = vmatmul.mubr.msk.f32.vlgmr.msra.gmra.mrb[0].mxu0 %vm44_vm0, %v41_v14  ;;  %v845_v25 = vpack.c.bf16 %v616_v23, %v615_v22  ;;  %p906_p6 = pnand %p905_p5, %p899_p2 }
  0x2e   :  { %773 = vmatmul.mubr.msk.f32.vlgmr.msra.gmra.mrb[0].mxu1 %vm44_vm0, %v41_v14  ;;  %828 = vmatpush3.bf16.msra.mxu0 %v825_v10 }
  0x2f   :  { %832 = vmatpush3.bf16.msra.mxu1 %v829_v15  ;;  %779 = vmatprep.mubr.msk.f32.mxu0 %vm44_vm0, %v40_v5 }
  0x30   :  { %786 = vmatprep.mubr.msk.f32.mxu1 %vm44_vm0, %v40_v5  ;;  %834 = vmatprep.subr.bf16.mxu0 %v833_v18 }
  0x31   :  { %780 = vmatmul.mubr.msk.f32.vlgmr.msra.gmra.mrb[2].mxu0 %vm44_vm0, %v41_v14  ;;  %838 = vmatprep.subr.bf16.mxu1 %v837_v19 }
  0x32   :  { %787 = vmatmul.mubr.msk.f32.vlgmr.msra.gmra.mrb[2].mxu1 %vm44_vm0, %v41_v14  ;;  %836 = vmatpush3.bf16.msra.mxu0 %v833_v18 }
  0x33   :  { %840 = vmatpush3.bf16.msra.mxu1 %v837_v19  ;;  %793 = vmatprep.mubr.msk.f32.mxu0 %vm44_vm0, %v40_v5 }
  0x34   :  { %800 = vmatprep.mubr.msk.f32.mxu1 %vm44_vm0, %v40_v5  ;;  %842 = vmatprep.subr.bf16.mxu0 %v841_v24 }
  0x35   :  { %794 = vmatmul.mubr.msk.f32.vlgmr.msra.gmra.mrb[4].mxu0 %vm44_vm0, %v41_v14  ;;  %846 = vmatprep.subr.bf16.mxu1 %v845_v25 }
  0x36   :  { %801 = vmatmul.mubr.msk.f32.vlgmr.msra.gmra.mrb[4].mxu1 %vm44_vm0, %v41_v14  ;;  %844 = vmatpush3.bf16.msra.mxu0 %v841_v24 }
  0x37   :  { %848 = vmatpush3.bf16.msra.mxu1 %v845_v25  ;;  %807 = vmatprep.mubr.msk.f32.mxu0 %vm44_vm0, %v40_v5 }
  0x38   :  { %814 = vmatprep.mubr.msk.f32.mxu1 %vm44_vm0, %v40_v5 }
  0x39   :  { %808 = vmatmul.mubr.msk.f32.vlgmr.msra.gmra.mrb[6].mxu0 %vm44_vm0, %v41_v14 }
  0x3a   :  { %815 = vmatmul.mubr.msk.f32.vlgmr.msra.gmra.mrb[6].mxu1 %vm44_vm0, %v41_v14 }
 0x100   :  { %v767_v26 = vpop.f32.mrb[0].mxu0 }
 0x101   :  { %127 = vst.msk [vmem:[#allocation7 + $0x8] sm:$0xff] %vm44_vm0, %v767_v26  ;;  %v774_v27 = vpop.f32.mrb[0].mxu1  ;;  %v117_v28 = vpop.f32.mrb[1].mxu0 }
 0x102   :  { %208 = vst.msk [vmem:[#allocation7 + $0x18] sm:$0xff] %vm44_vm0, %v774_v27  ;;  %126 = vst.msk [vmem:[#allocation7] sm:$0xff] %vm44_vm0, %v117_v28  ;;  %v197_v29 = vpop.f32.mrb[1].mxu1 }
 0x103   :  { %207 = vst.msk [vmem:[#allocation7 + $0x10] sm:$0xff] %vm44_vm0, %v197_v29 }
 0x104   :  { %v781_v30 = vpop.f32.mrb[2].mxu0 }
 0x105   :  { %289 = vst.msk [vmem:[#allocation7 + $0x28] sm:$0xff] %vm44_vm0, %v781_v30  ;;  %v788_v31 = vpop.f32.mrb[2].mxu1  ;;  %v278_v32 = vpop.f32.mrb[3].mxu0 }
 0x106   :  { %370 = vst.msk [vmem:[#allocation7 + $0x38] sm:$0xff] %vm44_vm0, %v788_v31  ;;  %288 = vst.msk [vmem:[#allocation7 + $0x20] sm:$0xff] %vm44_vm0, %v278_v32  ;;  %v359_v33 = vpop.f32.mrb[3].mxu1 }
 0x107   :  { %369 = vst.msk [vmem:[#allocation7 + $0x30] sm:$0xff] %vm44_vm0, %v359_v33 }
 0x108   :  { %v795_v34 = vpop.f32.mrb[4].mxu0 }
 0x109   :  { %451 = vst.msk [vmem:[#allocation7 + $0x48] sm:$0xff] %vm44_vm0, %v795_v34  ;;  %v802_v35 = vpop.f32.mrb[4].mxu1  ;;  %v440_v36 = vpop.f32.mrb[5].mxu0 }
 0x10a   :  { %532 = vst.msk [vmem:[#allocation7 + $0x58] sm:$0xff] %vm44_vm0, %v802_v35  ;;  %450 = vst.msk [vmem:[#allocation7 + $0x40] sm:$0xff] %vm44_vm0, %v440_v36  ;;  %v521_v37 = vpop.f32.mrb[5].mxu1 }
 0x10b   :  { %531 = vst.msk [vmem:[#allocation7 + $0x50] sm:$0xff] %vm44_vm0, %v521_v37 }
 0x10c   :  { %v809_v38 = vpop.f32.mrb[6].mxu0 }
 0x10d   :  { %613 = vst.msk [vmem:[#allocation7 + $0x68] sm:$0xff] %vm44_vm0, %v809_v38  ;;  %v816_v39 = vpop.f32.mrb[6].mxu1  ;;  %v602_v40 = vpop.f32.mrb[7].mxu0 }
 0x10e   :  { %694 = vst.msk [vmem:[#allocation7 + $0x78] sm:$0xff] %vm44_vm0, %v816_v39  ;;  %612 = vst.msk [vmem:[#allocation7 + $0x60] sm:$0xff] %vm44_vm0, %v602_v40  ;;  %v683_v41 = vpop.f32.mrb[7].mxu1 }
 0x10f   :  { %693 = vst.msk [vmem:[#allocation7 + $0x70] sm:$0xff] %vm44_vm0, %v683_v41 }
 0x110   :  { %909 = shalt.err (!%p906_p6)
}
 0x111   :  { %s910_s10 = scalar_lea.hbm %s1025_s2, 2048 }
 0x112   :  { %p911_p7 = scmp.ne.s32.totalorder %s1025_s2, %s910_s10  ;;  %p914_p8 = scmp.lt.u32.totalorder %s910_s10, %s1025_s2 }
 0x114   :  { %p916_p9 = pnand %p914_p8, %p911_p7 }
 0x116   :  { %919 = shalt.err (!%p916_p9)
}
 0x117   :  { %706 = dma.vmem_to_hbm [thread:$0]  %s701_s6, 2048, %s1025_s2, [#allocation4], %s927_s19, %s927_s19, %s928_s20  }
 0x118   :  { %924 = dma.done.wait [#allocation4], 2048  }
 0x119   :  { %925 = vsyncadd [#allocation4], 4294965248 }
 0x11a   :  { %710 = vsyncpa [#allocation3], 1 }
 0x11b   :  { %711 = vsyncpa [#allocation6], 1 }
 0x11c   :  { %712 = vsyncpa [#allocation4], 1 }

</bundles_post_ra>
